<compile_context>
chip_gen: v5e
topology: v5e:2x2
jax: 0.10.0
libtpu: 0.0.40
codegen_flags: <defaults>
</compile_context>

<pallas_src>
import functools

import jax
import jax.numpy as jnp
from jax import lax
from jax.experimental import pallas as pl
from jax.experimental.pallas import tpu as pltpu

# N-tile for the large-N (B*H*W) path.  Multiple of 8; sized so that with
# typical diffusion dims (C=320, D=1280, f32) the double-buffered x/out tiles
# plus resident weights stay well inside v7x's 32 MiB scoped VMEM default.
_TILE_N = 256


def _timestep_embedding_kernel(x_ref, w1_ref, b1_ref, w2_ref, b2_ref, o_ref):
    """Fused: y = silu(x @ w1.T + b1) @ w2.T + b2  (PyTorch (out,in) weights)."""
    x = x_ref[...]

    # linear_1 (1x1 conv == matmul): contract (n, C) with (D, C) on C.
    h = lax.dot_general(
        x, w1_ref[...],
        dimension_numbers=(((1,), (1,)), ((), ())),
        preferred_element_type=jnp.float32)
    h = h + b1_ref[...].astype(jnp.float32)

    # SiLU in f32: sigmoid -> EUP, mul -> VPU.
    h = h * jax.nn.sigmoid(h)

    # linear_2: contract (n, D) with (D_out, D) on D.  Feed the MXU in the
    # weight's native dtype (no-op for f32, bf16 path stays on the fast MXU).
    y = lax.dot_general(
        h.astype(w2_ref.dtype), w2_ref[...],
        dimension_numbers=(((1,), (1,)), ((), ())),
        preferred_element_type=jnp.float32)
    y = y + b2_ref[...].astype(jnp.float32)

    o_ref[...] = y.astype(o_ref.dtype)


@functools.partial(jax.jit, static_argnames=("act_fn",))
def timestep_embedding(sample, w1, b1, w2, b2, act_fn="silu"):
    """Pallas-fused TimestepEmbedding forward.

    sample: (B, C) or (B, C, H, W)        (PyTorch NCHW convention)
    w1:     (D, C, 1, 1) or (D, C)        (PyTorch conv weight layout, (out, in))
    b1:     (D,)
    w2:     (D, D, 1, 1) or (D, D)
    b2:     (D,)
    Returns (B, D, 1, 1) for 2-D input, (B, D, H, W) for 4-D input.
    """
    if act_fn != "silu":
        # TODO(synk): only act_fn='silu' is implemented (matches the module default).
        raise NotImplementedError("only act_fn='silu' is implemented")

    if sample.ndim == 2:
        B, C = sample.shape
        H = W = 1
        x2d = sample  # (N=B, C)
    else:
        B, C, H, W = sample.shape
        # NCHW -> NHWC -> (N, C) pixel-major layout (1x1 conv == per-pixel matmul).
        x2d = jnp.transpose(sample, (0, 2, 3, 1)).reshape(B * H * W, C)

    # Squeeze 1x1 conv kernels to dense (out, in) matrices -- free reshape, no
    # transpose materialization.  Biases as (1, D) rows.
    D = w1.shape[0]
    w1m = w1.reshape(D, C)       # (D, C)
    w2m = w2.reshape(D, D)       # (D, D)
    b1m = b1.reshape(1, D)
    b2m = b2.reshape(1, D)

    N = x2d.shape[0]

    if N <= _TILE_N:
        # Small-N fast path: single block, grid=(1,), no pipelining overhead.
        tile_n = N
        grid = (1,)
    else:
        tile_n = _TILE_N
        grid = (pl.cdiv(N, tile_n),)

    out2d = pl.pallas_call(
        _timestep_embedding_kernel,
        out_shape=jax.ShapeDtypeStruct((N, D), sample.dtype),
        grid_spec=pltpu.PrefetchScalarGridSpec(
            num_scalar_prefetch=0,
            grid=grid,
            in_specs=[
                # Activations: tiled over N, double-buffered by the pipeline.
                pl.BlockSpec((tile_n, C), lambda i: (i, 0)),
                # Weights / biases: same block every step -> VMEM-resident.
                pl.BlockSpec((D, C), lambda i: (0, 0)),
                pl.BlockSpec((1, D), lambda i: (0, 0)),
                pl.BlockSpec((D, D), lambda i: (0, 0)),
                pl.BlockSpec((1, D), lambda i: (0, 0)),
            ],
            out_specs=pl.BlockSpec((tile_n, D), lambda i: (i, 0)),
        ),
        compiler_params=pltpu.CompilerParams(
            # N-tiles are independent (no reduction axis) -> megacore on v7x.
            dimension_semantics=("parallel",)),
    )(x2d, w1m, b1m, w2m, b2m)

    # Back to PyTorch output layout.
    out = out2d.reshape(B, H, W, D)
    out = jnp.transpose(out, (0, 3, 1, 2))  # (B, D, H, W)
    return out


def _reference(sample, w1, b1, w2, b2):
    """Plain-JAX reference mirroring the PyTorch module exactly."""
    if sample.ndim == 2:
        sample = sample[:, :, None, None]
    x = jnp.transpose(sample, (0, 2, 3, 1))  # NHWC
    w1m = w1.reshape(w1.shape[0], w1.shape[1])
    w2m = w2.reshape(w2.shape[0], w2.shape[1])
    h = jnp.einsum("bhwc,dc->bhwd", x, w1m) + b1
    h = h * jax.nn.sigmoid(h)
    y = jnp.einsum("bhwd,ed->bhwe", h, w2m) + b2
    return jnp.transpose(y, (0, 3, 1, 2))


if __name__ == "__main__":
    key = jax.random.PRNGKey(0)
    k_x, k_w1, k_b1, k_w2, k_b2, k_x4 = jax.random.split(key, 6)

    batch = 8
    channel = 32          # input channels (timestep proj dim)
    time_embed_dim = 128  # embedding dim

    # PyTorch conv weight layout: (out, in, 1, 1).
    w1 = jax.random.normal(k_w1, (time_embed_dim, channel, 1, 1), jnp.float32) * 0.05
    b1 = jax.random.normal(k_b1, (time_embed_dim,), jnp.float32) * 0.05
    w2 = jax.random.normal(k_w2, (time_embed_dim, time_embed_dim, 1, 1), jnp.float32) * 0.05
    b2 = jax.random.normal(k_b2, (time_embed_dim,), jnp.float32) * 0.05

    # --- Canonical 2-D timestep path (small-N fast path, grid=(1,)) ---
    sample2d = jax.random.normal(k_x, (batch, channel), dtype=jnp.float32)
    out2 = timestep_embedding(sample2d, w1, b1, w2, b2)
    jax.block_until_ready(out2)
    ref2 = _reference(sample2d, w1, b1, w2, b2)
    assert out2.shape == (batch, time_embed_dim, 1, 1), out2.shape
    assert jnp.allclose(out2, ref2, atol=2e-5, rtol=1e-5), float(
        jnp.max(jnp.abs(out2 - ref2)))

    # --- 4-D conv path (large N = B*H*W -> tiled/pipelined, parallel grid) ---
    b4, h4, w4 = 2, 16, 16  # N = 512 -> 2 tiles of 256
    sample4d = jax.random.normal(k_x4, (b4, channel, h4, w4), dtype=jnp.float32)
    out4 = timestep_embedding(sample4d, w1, b1, w2, b2)
    jax.block_until_ready(out4)
    ref4 = _reference(sample4d, w1, b1, w2, b2)
    assert out4.shape == (b4, time_embed_dim, h4, w4), out4.shape
    assert jnp.allclose(out4, ref4, atol=2e-5, rtol=1e-5), float(
        jnp.max(jnp.abs(out4 - ref4)))

    print("KERNEL_OK")
</pallas_src>

<mosaic_0001>
module attributes {stable_mosaic.version = 11 : i64} {
  func.func @_timestep_embedding_kernel(%arg0: i32, %arg1: memref<8x32xf32, #tpu.memory_space<vmem>>, %arg2: memref<128x32xf32, #tpu.memory_space<vmem>>, %arg3: memref<1x128xf32, #tpu.memory_space<vmem>>, %arg4: memref<128x128xf32, #tpu.memory_space<vmem>>, %arg5: memref<1x128xf32, #tpu.memory_space<vmem>>, %arg6: memref<8x128xf32, #tpu.memory_space<vmem>>) attributes {dimension_semantics = [#tpu.dimension_semantics<parallel>], iteration_bounds = array<i64: 1>, scalar_prefetch = 0 : i64, scratch_operands = 0 : i64, tpu.core_type = #tpu.core_type<tc>, window_params = [{transform_indices = @transform_0, window_bounds = array<i64: 8, 32>}, {pipeline_mode = #tpu.pipeline_mode<synchronous>, transform_indices = @transform_1, window_bounds = array<i64: 128, 32>}, {pipeline_mode = #tpu.pipeline_mode<synchronous>, transform_indices = @transform_2, window_bounds = array<i64: 1, 128>}, {pipeline_mode = #tpu.pipeline_mode<synchronous>, transform_indices = @transform_3, window_bounds = array<i64: 128, 128>}, {pipeline_mode = #tpu.pipeline_mode<synchronous>, transform_indices = @transform_4, window_bounds = array<i64: 1, 128>}, {transform_indices = @transform_5, window_bounds = array<i64: 8, 128>}]} {
    %c0 = arith.constant 0 : index
    %c0_0 = arith.constant 0 : index
    %0 = vector.load %arg1[%c0, %c0_0] : memref<8x32xf32, #tpu.memory_space<vmem>>, vector<8x32xf32>
    %c0_1 = arith.constant 0 : index
    %c0_2 = arith.constant 0 : index
    %1 = vector.load %arg2[%c0_1, %c0_2] : memref<128x32xf32, #tpu.memory_space<vmem>>, vector<128x32xf32>
    %cst = arith.constant dense<0.000000e+00> : vector<8x128xf32>
    %2 = tpu.matmul %0, %1, %cst {dimension_numbers = #tpu.dot_dimension_numbers<[1], [1], [0], [0], [0, 0, 1, 0], [], []>} : vector<8x32xf32>, vector<128x32xf32>, vector<8x128xf32> -> vector<8x128xf32>
    %c0_3 = arith.constant 0 : index
    %c0_4 = arith.constant 0 : index
    %3 = vector.load %arg3[%c0_3, %c0_4] : memref<1x128xf32, #tpu.memory_space<vmem>>, vector<1x128xf32>
    %4 = vector.broadcast %3 : vector<1x128xf32> to vector<8x128xf32>
    %5 = arith.addf %2, %4 : vector<8x128xf32>
    %6 = arith.negf %5 : vector<8x128xf32>
    %7 = math.exp %6 : vector<8x128xf32>
    %cst_5 = arith.constant 1.000000e+00 : f32
    %8 = vector.broadcast %cst_5 : f32 to vector<8x128xf32>
    %9 = arith.addf %8, %7 : vector<8x128xf32>
    %10 = arith.divf %8, %9 : vector<8x128xf32>
    %11 = arith.mulf %5, %10 : vector<8x128xf32>
    %c0_6 = arith.constant 0 : index
    %c0_7 = arith.constant 0 : index
    %12 = vector.load %arg4[%c0_6, %c0_7] : memref<128x128xf32, #tpu.memory_space<vmem>>, vector<128x128xf32>
    %cst_8 = arith.constant dense<0.000000e+00> : vector<8x128xf32>
    %13 = tpu.matmul %11, %12, %cst_8 {dimension_numbers = #tpu.dot_dimension_numbers<[1], [1], [0], [0], [0, 0, 1, 0], [], []>} : vector<8x128xf32>, vector<128x128xf32>, vector<8x128xf32> -> vector<8x128xf32>
    %c0_9 = arith.constant 0 : index
    %c0_10 = arith.constant 0 : index
    %14 = vector.load %arg5[%c0_9, %c0_10] : memref<1x128xf32, #tpu.memory_space<vmem>>, vector<1x128xf32>
    %15 = vector.broadcast %14 : vector<1x128xf32> to vector<8x128xf32>
    %16 = arith.addf %13, %15 : vector<8x128xf32>
    %c0_11 = arith.constant 0 : index
    %c0_12 = arith.constant 0 : index
    %17 = vector.load %arg6[%c0_11, %c0_12] : memref<8x128xf32, #tpu.memory_space<vmem>>, vector<8x128xf32>
    tpu.vector_store %arg6[%c0_11, %c0_12], %16 {strides = array<i32>} : memref<8x128xf32, #tpu.memory_space<vmem>>, vector<8x128xf32>,
    return
  }
  func.func @transform_0(%arg0: i32) -> (i32, i32) {
    %c0_i32 = arith.constant 0 : i32
    %c0_i32_0 = arith.constant 0 : i32
    return %arg0, %c0_i32 : i32, i32
  }
  func.func @transform_1(%arg0: i32) -> (i32, i32) {
    %c0_i32 = arith.constant 0 : i32
    %c0_i32_0 = arith.constant 0 : i32
    %c0_i32_1 = arith.constant 0 : i32
    return %c0_i32, %c0_i32_0 : i32, i32
  }
  func.func @transform_2(%arg0: i32) -> (i32, i32) {
    %c0_i32 = arith.constant 0 : i32
    %c0_i32_0 = arith.constant 0 : i32
    %c0_i32_1 = arith.constant 0 : i32
    return %c0_i32, %c0_i32_0 : i32, i32
  }
  func.func @transform_3(%arg0: i32) -> (i32, i32) {
    %c0_i32 = arith.constant 0 : i32
    %c0_i32_0 = arith.constant 0 : i32
    %c0_i32_1 = arith.constant 0 : i32
    return %c0_i32, %c0_i32_0 : i32, i32
  }
  func.func @transform_4(%arg0: i32) -> (i32, i32) {
    %c0_i32 = arith.constant 0 : i32
    %c0_i32_0 = arith.constant 0 : i32
    %c0_i32_1 = arith.constant 0 : i32
    return %c0_i32, %c0_i32_0 : i32, i32
  }
  func.func @transform_5(%arg0: i32) -> (i32, i32) {
    %c0_i32 = arith.constant 0 : i32
    %c0_i32_0 = arith.constant 0 : i32
    return %arg0, %c0_i32 : i32, i32
  }
}

</mosaic_0001>

<bundles_post_ra>
// kernel: timestep_embedding.1
= control target key start
LH: loop header
LB: loop body
LE: loop exit
PB: predicated region body
PF: predicated region fallthrough
CT: control target
= control target key end

     0   :  { %vm42_vm0 = vcmask 261120   ;;  %s398_s0 = inlined_call_operand.vmem [shape: f32[8,32], index: 0, kind: input, shape index: {}]   ;;  %s399_s1 = inlined_call_operand.vmem [shape: f32[128,32], index: 1, kind: input, shape index: {}]   ;;  %s400_s2 = inlined_call_operand.vmem [shape: f32[1,128], index: 2, kind: input, shape index: {}]   ;;  %s401_s3 = inlined_call_operand.vmem [shape: f32[128,128], index: 3, kind: input, shape index: {}]   ;;  %s402_s4 = inlined_call_operand.vmem [shape: f32[1,128], index: 4, kind: input, shape index: {}]   ;;  %s403_s5 = inlined_call_operand.hbm [shape: f32[8,128], index: 5, kind: output, shape index: {}]  }
   0x1   :  { %v37_v0 = vld [vmem:[%s399_s1 + $0x78] sm:$0xff]  ;;  %v36_v1 = vld [vmem:[%s399_s1 + $0x70] sm:$0xff] }
   0x2   :  { %191 = vmatpush.xpose.msk.msra.mxu0 %vm42_vm0, %v37_v0 }
   0x3   :  { %10 = vsyncpa [#allocation3], 0  ;;  %v35_v2 = vld [vmem:[%s399_s1 + $0x68] sm:$0xff]  ;;  %v34_v3 = vld [vmem:[%s399_s1 + $0x60] sm:$0xff]  ;;  %s242_s9 = smov [#allocation2]   ;;  %s182_s13 = sshll.u32 %s403_s5, 4  ;;  %s183_s13 = int_to_ptr.hbm [resolvable:$true] %s182_s13 }
   0x4   :  { %v33_v4 = vld [vmem:[%s399_s1 + $0x58] sm:$0xff]  ;;  %v32_v5 = vld [vmem:[%s399_s1 + $0x50] sm:$0xff]  ;;  %v31_v6 = vld [vmem:[%s399_s1 + $0x48] sm:$0xff]  ;;  %s180_s10 = sshll.u32 %s242_s9, 4  ;;  %s181_s10 = int_to_ptr.vmem [resolvable:$true] %s180_s10 }
   0x5   :  { %v30_v7 = vld [vmem:[%s399_s1 + $0x40] sm:$0xff]  ;;  %v29_v8 = vld [vmem:[%s399_s1 + $0x38] sm:$0xff]  ;;  %v28_v10 = vld [vmem:[%s399_s1 + $0x30] sm:$0xff] }
   0x6   :  { %192 = vmatpush.xpose.msk.msra.mxu0 %vm42_vm0, %v36_v1  ;;  %v149_v9 = vld [vmem:[%s401_s3 + $0x78] sm:$0xff]  ;;  %v148_v11 = vld [vmem:[%s401_s3 + $0x70] sm:$0xff]  ;;  %v27_v12 = vld [vmem:[%s399_s1 + $0x28] sm:$0xff] }
   0x7   :  { %154 = vmatpush.xpose.msra.mxu1 %v149_v9  ;;  %v147_v13 = vld [vmem:[%s401_s3 + $0x68] sm:$0xff]  ;;  %v26_v14 = vld [vmem:[%s399_s1 + $0x20] sm:$0xff]  ;;  %v25_v16 = vld [vmem:[%s399_s1 + $0x18] sm:$0xff] }
   0x8   :  { %v146_v15 = vld [vmem:[%s401_s3 + $0x60] sm:$0xff]  ;;  %v145_v17 = vld [vmem:[%s401_s3 + $0x58] sm:$0xff]  ;;  %v24_v18 = vld [vmem:[%s399_s1 + $0x10] sm:$0xff] }
   0x9   :  { %v144_v19 = vld [vmem:[%s401_s3 + $0x50] sm:$0xff]  ;;  %v23_v20 = vld [vmem:[%s399_s1 + $0x8] sm:$0xff]  ;;  %v22_v22 = vld [vmem:[%s399_s1] sm:$0xff] }
   0xa   :  { %193 = vmatpush.xpose.msk.msra.mxu0 %vm42_vm0, %v35_v2  ;;  %v143_v21 = vld [vmem:[%s401_s3 + $0x48] sm:$0xff]  ;;  %v142_v23 = vld [vmem:[%s401_s3 + $0x40] sm:$0xff]  ;;  %v141_v25 = vld [vmem:[%s401_s3 + $0x38] sm:$0xff] }
   0xb   :  { %155 = vmatpush.xpose.msra.mxu1 %v148_v11  ;;  %v21_v24 = vld [vmem:[%s398_s0] sm:$0xff]  ;;  %v140_v26 = vld [vmem:[%s401_s3 + $0x30] sm:$0xff]  ;;  %v139_v27 = vld [vmem:[%s401_s3 + $0x28] sm:$0xff] }
   0xc   :  { %v138_v28 = vld [vmem:[%s401_s3 + $0x20] sm:$0xff]  ;;  %v137_v29 = vld [vmem:[%s401_s3 + $0x18] sm:$0xff]  ;;  %v136_v30 = vld [vmem:[%s401_s3 + $0x10] sm:$0xff] }
   0xd   :  { %v135_v31 = vld [vmem:[%s401_s3 + $0x8] sm:$0xff]  ;;  %v134_v32 = vld [vmem:[%s401_s3] sm:$0xff] }
   0xe   :  { %194 = vmatpush.xpose.msk.msra.mxu0 %vm42_vm0, %v34_v3  ;;  %v210_v33 = vld [vmem:[%s400_s2] ss:$0 sm:$0xff] }
   0xf   :  { %156 = vmatpush.xpose.msra.mxu1 %v147_v13  ;;  %v211_v50 = vld [vmem:[%s402_s4] ss:$0 sm:$0xff] }
  0x12   :  { %195 = vmatpush.xpose.msk.msra.mxu0 %vm42_vm0, %v33_v4 }
  0x13   :  { %157 = vmatpush.xpose.msra.mxu1 %v146_v15 }
  0x16   :  { %196 = vmatpush.xpose.msk.msra.mxu0 %vm42_vm0, %v32_v5 }
  0x17   :  { %158 = vmatpush.xpose.msra.mxu1 %v145_v17 }
  0x1a   :  { %197 = vmatpush.xpose.msk.msra.mxu0 %vm42_vm0, %v31_v6 }
  0x1b   :  { %159 = vmatpush.xpose.msra.mxu1 %v144_v19 }
  0x1e   :  { %198 = vmatpush.xpose.msk.msra.mxu0 %vm42_vm0, %v30_v7 }
  0x1f   :  { %160 = vmatpush.xpose.msra.mxu1 %v143_v21 }
  0x22   :  { %199 = vmatpush.xpose.msk.msra.mxu0 %vm42_vm0, %v29_v8 }
  0x23   :  { %161 = vmatpush.xpose.msra.mxu1 %v142_v23 }
  0x26   :  { %200 = vmatpush.xpose.msk.msra.mxu0 %vm42_vm0, %v28_v10 }
  0x27   :  { %162 = vmatpush.xpose.msra.mxu1 %v141_v25 }
  0x2a   :  { %201 = vmatpush.xpose.msk.msra.mxu0 %vm42_vm0, %v27_v12 }
  0x2b   :  { %163 = vmatpush.xpose.msra.mxu1 %v140_v26 }
  0x2e   :  { %202 = vmatpush.xpose.msk.msra.mxu0 %vm42_vm0, %v26_v14 }
  0x2f   :  { %164 = vmatpush.xpose.msra.mxu1 %v139_v27 }
  0x32   :  { %203 = vmatpush.xpose.msk.msra.mxu0 %vm42_vm0, %v25_v16 }
  0x33   :  { %165 = vmatpush.xpose.msra.mxu1 %v138_v28 }
  0x36   :  { %204 = vmatpush.xpose.msk.msra.mxu0 %vm42_vm0, %v24_v18 }
  0x37   :  { %166 = vmatpush.xpose.msra.mxu1 %v137_v29 }
  0x3a   :  { %205 = vmatpush.xpose.msk.msra.mxu0 %vm42_vm0, %v23_v20 }
  0x3b   :  { %167 = vmatpush.xpose.msra.mxu1 %v136_v30 }
  0x3e   :  { %206 = vmatpush.xpose.msk.msra.mxu0 %vm42_vm0, %v22_v22 }
  0x3f   :  { %168 = vmatpush.xpose.msra.mxu1 %v135_v31 }
  0x41   :  { %207 = vmatmul.msk.f32.vlgmr.msra.gmra.mxu0 %vm42_vm0, %v21_v24 }
  0x43   :  { %169 = vmatpush.xpose.msra.mxu1 %v134_v32 }
  0xbe   :  { %v111_v34 = vpop.f32.mrf.mxu0 }
  0xbf   :  { %v112_v35 = vadd.f32 %v210_v33, %v111_v34 }
  0xc1   :  { %v208_v36 = vmul.f32 -1.442695, %v112_v35 }
  0xc3   :  { %212 = vpow2.f32 %v208_v36 }
  0xc9   :  { %v213_v37 = vpop.eup %212 }
  0xca   :  { %v117_v38 = vadd.f32 1.0, %v213_v37 }
  0xcc   :  { %214 = vrcp.f32 %v117_v38  ;;  %v129_v42 = vand.u32 2147483648, %v117_v38  ;;  %v127_v44 = vand.u32 2147483647, %v117_v38  ;;  %vm123_vm2 = vweird.f32 %v117_v38 }
  0xce   :  { %v130_v46 = vor.u32 1.1754944e-38, %v129_v42  ;;  %vm128_vm4 = vcmp.eq.f32.partialorder %v127_v44, 8.507059e+37 }
  0xd2   :  { %v215_v39 = vpop.eup %214 }
  0xd3   :  { %v119_v40 = vmul.f32 %v215_v39, %v117_v38  ;;  %vm124_vm1 = vweird.f32 %v215_v39 }
  0xd4   :  { %vm125_vm3 = vmor %vm123_vm2, %vm124_vm1 }
  0xd5   :  { %v120_v41 = vsub.f32 1.0, %v119_v40 }
  0xd7   :  { %v121_v43 = vmul.f32 %v215_v39, %v120_v41 }
  0xd9   :  { %v122_v45 = vadd.f32 %v215_v39, %v121_v43 }
  0xdb   :  { %v126_v47 = vsel %vm125_vm3, %v215_v39, %v122_v45 }
  0xdc   :  { %v131_v48 = vsel %vm128_vm4, %v130_v46, %v126_v47 }
  0xdd   :  { %v133_v49 = vmul.f32 %v131_v48, %v112_v35 }
  0xdf   :  { %170 = vmatmul.f32.vlgmr.msra.gmra.mxu1 %v133_v49 }
 0x15c   :  { %v171_v51 = vpop.f32.mrf.mxu1 }
 0x15d   :  { %v172_v52 = vadd.f32 %v211_v50, %v171_v51 }
 0x15f   :  { %174 = vst [vmem:[#allocation2] sm:$0xff] %v172_v52 }
 0x160   :  { %185 = dma.vmem_to_hbm [thread:$0]  %s181_s10, 128, %s183_s13, [#allocation3]  }
 0x161   :  { %240 = dma.done.wait [#allocation3], 128  }
 0x162   :  { %241 = vsyncadd [#allocation3], 4294967168 }
 0x163   :  { %190 = vsyncpa [#allocation3], 1 }

</bundles_post_ra>
